<compile_context>
chip_gen: v7x
topology: tpu7x:2x2x1
jax: 0.10.0
libtpu: 0.0.40
codegen_flags: <defaults>
</compile_context>

<pallas_src>
import numpy as np

import jax
import jax.numpy as jnp
from jax.experimental import pallas as pl
from jax.experimental.pallas import tpu as pltpu


_SEL_BYTES_CAP = 2 << 20        # keep the resident constant (and its MXU cost) small
_MAX_LANE_W = 512               # cap packed output lane width (bounds flops/byte)
_STREAM_VMEM_BUDGET = 20 << 20  # double-buffered streaming arrays (x, out, mask)
_VMEM_LIMIT_CAP = 60 << 20      # stay under v7x's 64 MiB/TC physical VMEM


def _round_up(x, m):
    return ((x + m - 1) // m) * m


def _cdiv(a, b):
    return -(-a // b)


def _control_reward_kernel(x_ref, sel_ref, bcast_ref, mask_ref, out_ref):
    """One tile of packed rows.

    x_ref:     [tile, 2W]  interleaved actions for G agents per row (native dtype)
    sel_ref:   [2W, W]     block-diagonal deinterleave matrix, -w_a/-w_yaw baked in
    bcast_ref: [G,  W]     ones-block matrix broadcasting per-agent mask over T lanes
    mask_ref:  [tile, G]   int8, 1 = agent masked out, 0 = valid
    out_ref:   [tile, W]
    """
    x = x_ref[...].astype(jnp.float32)
    sq = x * x                                                   # VPU
    # MXU: column (g*T + t) of sel has -w_a at row (g*2T + 2t) and -w_yaw at
    # row (g*2T + 2t + 1), so this is the deinterleave + weight + negate.
    neg_cost = jnp.dot(sq, sel_ref[...], preferred_element_type=jnp.float32)
    valid = 1.0 - mask_ref[...].astype(jnp.float32)              # [tile, G]
    if bcast_ref.shape[0] == 1:
        # G == 1: [tile, 1] broadcasts over the W lanes directly.
        masked = neg_cost * valid
    else:
        # Broadcast the per-agent mask across its T lanes on the (idle) MXU.
        mask_w = jnp.dot(valid, bcast_ref[...], preferred_element_type=jnp.float32)
        masked = neg_cost * mask_w
    out_ref[...] = masked.astype(out_ref.dtype)


def _choose_pack(n_rows, t):
    """Pick G agents per packed row so the output lane width W = G*T is as
    lane-dense as possible (multiple of 128 when a divisor of N allows it),
    with bounded size/flops for the block-diagonal selection matmul."""
    if n_rows == 0 or t % 128 == 0:
        return 1
    best = (0.0, 0, 1)                      # (density, -W, G) -> maximise
    for g in range(1, min(n_rows, 128) + 1):
        if n_rows % g:
            continue
        w = g * t
        if w > _MAX_LANE_W:
            break
        if (2 * w) * w * 4 > _SEL_BYTES_CAP:
            break
        density = w / _round_up(w, 128)
        cand = (density, -w, g)             # prefer dense, then narrower (fewer flops)
        if cand > best:
            best = cand
    return best[2]


def _row_bytes(w_out, g, in_itemsize, out_itemsize):
    """(8,128)-padded VMEM bytes per packed row for one buffer of each stream."""
    return (_round_up(2 * w_out, 128) * in_itemsize
            + _round_up(w_out, 128) * out_itemsize
            + _round_up(g, 128) * 1)        # int8 mask


def _auto_tile(r_rows, row_b):
    tile = max(8, _STREAM_VMEM_BUDGET // max(2 * row_b, 1))
    # v7x megacore: prefer >= 8 grid steps when that still keeps each block's
    # streaming payload >= ~1 MiB (per-step overhead ~0.35 us).
    min_rows_1mib = max(8, (1 << 20) // max(row_b, 1))
    eight_steps = _round_up(_cdiv(r_rows, 8), 8)
    if eight_steps >= min_rows_1mib:
        tile = min(tile, eight_steps)
    return tile


def _clamp_tile(tile, r_rows):
    if tile >= r_rows:
        return r_rows                       # single full-extent block (any size OK)
    return max(8, (tile // 8) * 8)          # sublane multiple


def _vmem_limit(tile, row_b, w_out, g):
    sel_b = _round_up(2 * w_out, 8) * _round_up(w_out, 128) * 4
    bcast_b = _round_up(g, 8) * _round_up(w_out, 128) * 4
    need = 2 * tile * row_b + 2 * (sel_b + bcast_b)   # double-buffered streams + consts
    return int(min(max(need + need // 4 + (2 << 20), 16 << 20), _VMEM_LIMIT_CAP))


def control_reward(action_pred, agents_mask, weight_a=1.0, weight_yaw=1.0, *, tile_n=None):
    """action_pred: [B, A, T, 2] (f32/bf16), agents_mask: [B, A] bool -> [B, A, T].

    Output dtype matches action_pred (compute is f32 in-kernel).
    weight_a / weight_yaw must be static Python scalars.
    """
    B, A, T, C = action_pred.shape
    assert C == 2, "last dim of action_pred must be (accel, yaw)"
    N = B * A
    in_dtype = action_pred.dtype
    out_dtype = in_dtype
    wa = float(weight_a)
    wy = float(weight_yaw)

    # --- Lane-dense agent packing -------------------------------------------
    G = _choose_pack(N, T)
    R = N // G
    W = G * T

    # Free, contiguous reinterpretations (no extra HBM pass).
    x = action_pred.reshape(R, 2 * W)                        # native dtype
    mask_i8 = agents_mask.reshape(R, G).astype(jnp.int8)     # 1 = masked-out agent

    # --- Host-side (numpy) constants ----------------------------------------
    cols = np.arange(W)
    g_idx = cols // T
    t_idx = cols % T
    sel = np.zeros((2 * W, W), np.float32)
    sel[g_idx * 2 * T + 2 * t_idx, cols] = -wa
    sel[g_idx * 2 * T + 2 * t_idx + 1, cols] = -wy
    bcast = np.zeros((G, W), np.float32)
    bcast[g_idx, cols] = 1.0
    sel = jnp.asarray(sel)
    bcast = jnp.asarray(bcast)

    # --- Tiling / VMEM plan ---------------------------------------------------
    row_b = _row_bytes(W, G, jnp.dtype(in_dtype).itemsize, jnp.dtype(out_dtype).itemsize)
    if tile_n is None:
        tile = _clamp_tile(_auto_tile(R, row_b), R)
    else:
        tile = int(tile_n)
        tile = R if tile >= R else max(8, (tile // 8) * 8)
    vmem_limit = _vmem_limit(tile, row_b, W, G)

    grid = (_cdiv(R, tile),)

    out = pl.pallas_call(
        _control_reward_kernel,
        out_shape=jax.ShapeDtypeStruct((R, W), out_dtype),
        grid=grid,
        in_specs=[
            # Full-minor-dim blocks -> contiguous HBM chunks per DMA.
            pl.BlockSpec((tile, 2 * W), lambda i: (i, 0)),
            pl.BlockSpec((2 * W, W), lambda i: (0, 0)),    # resident constant
            pl.BlockSpec((G, W), lambda i: (0, 0)),        # resident constant
            pl.BlockSpec((tile, G), lambda i: (i, 0)),
        ],
        out_specs=pl.BlockSpec((tile, W), lambda i: (i, 0)),
        compiler_params=pltpu.CompilerParams(
            dimension_semantics=("parallel",),   # independent tiles: v7x megacore shards
            vmem_limit_bytes=vmem_limit,
        ),
    )(x, sel, bcast, mask_i8)

    return out.reshape(B, A, T)


def _reference(action_pred, agents_mask, weight_a, weight_yaw):
    mask = ~agents_mask
    a = action_pred[..., 0].astype(jnp.float32)
    y = action_pred[..., 1].astype(jnp.float32)
    cost = a * a * weight_a + y * y * weight_yaw
    return -(cost * mask[..., None])


if __name__ == "__main__":
    key = jax.random.PRNGKey(0)
    k1, k2, k3, k4, k5, k6, k7, k8, k9, k10 = jax.random.split(key, 10)

    # --- Test 1: packed lane-dense path (G=16, W=128), single grid step ---
    B, A, T = 2, 64, 8
    ap = jax.random.normal(k1, (B, A, T, 2), dtype=jnp.float32)
    am = jax.random.bernoulli(k2, 0.3, (B, A))          # True = masked-out
    out = jax.block_until_ready(control_reward(ap, am, 0.75, 1.25))
    ref = _reference(ap, am, 0.75, 1.25)
    assert out.shape == (B, A, T) and out.dtype == jnp.float32
    assert jnp.allclose(out, ref, atol=1e-5, rtol=1e-5), "mismatch (test 1)"

    # --- Test 2: non-128-multiple packed width (G=13, W=208), R < 8 rows ---
    B, A, T = 2, 13, 16
    ap = jax.random.normal(k3, (B, A, T, 2), dtype=jnp.float32)
    am = jax.random.bernoulli(k4, 0.5, (B, A))
    out = jax.block_until_ready(control_reward(ap, am, 1.0, 2.0))
    assert jnp.allclose(out, _reference(ap, am, 1.0, 2.0), atol=1e-5, rtol=1e-5), "mismatch (test 2)"

    # --- Test 3: multi-step grid with a ragged last tile (tile_n override) ---
    B, A, T = 2, 72, 8       # N=144 -> G=16, R=9; tile_n=8 -> grid of 2 with partial tail
    ap = jax.random.normal(k5, (B, A, T, 2), dtype=jnp.float32)
    am = jax.random.bernoulli(k6, 0.4, (B, A))
    out = jax.block_until_ready(control_reward(ap, am, 0.5, 1.5, tile_n=8))
    assert jnp.allclose(out, _reference(ap, am, 0.5, 1.5), atol=1e-5, rtol=1e-5), "mismatch (test 3)"

    # --- Test 4: native bf16 I/O (compute stays f32 in-kernel) ---
    B, A, T = 2, 16, 8
    ap = jax.random.normal(k7, (B, A, T, 2), dtype=jnp.bfloat16)
    am = jax.random.bernoulli(k8, 0.3, (B, A))
    out = jax.block_until_ready(control_reward(ap, am, 1.0, 1.0))
    assert out.dtype == jnp.bfloat16
    assert jnp.allclose(out.astype(jnp.float32), _reference(ap, am, 1.0, 1.0),
                        atol=3e-2, rtol=3e-2), "mismatch (test 4)"

    # --- Test 5: already lane-dense T (G=1 fallback path, broadcast mask) ---
    B, A, T = 1, 4, 128
    ap = jax.random.normal(k9, (B, A, T, 2), dtype=jnp.float32)
    am = jax.random.bernoulli(k10, 0.5, (B, A))
    out = jax.block_until_ready(control_reward(ap, am, 2.0, 0.5))
    assert jnp.allclose(out, _reference(ap, am, 2.0, 0.5), atol=1e-5, rtol=1e-5), "mismatch (test 5)"

    print("KERNEL_OK")
</pallas_src>

<mosaic_0001>
module attributes {stable_mosaic.version = 11 : i64} {
  func.func @_control_reward_kernel(%arg0: i32, %arg1: memref<8x256xf32, #tpu.memory_space<vmem>>, %arg2: memref<256x128xf32, #tpu.memory_space<vmem>>, %arg3: memref<16x128xf32, #tpu.memory_space<vmem>>, %arg4: memref<8x16xi8, #tpu.memory_space<vmem>>, %arg5: memref<8x128xf32, #tpu.memory_space<vmem>>) attributes {dimension_semantics = [#tpu.dimension_semantics<parallel>], iteration_bounds = array<i64: 1>, scalar_prefetch = 0 : i64, scratch_operands = 0 : i64, tpu.core_type = #tpu.core_type<tc>, window_params = [{transform_indices = @transform_0, window_bounds = array<i64: 8, 256>}, {pipeline_mode = #tpu.pipeline_mode<synchronous>, transform_indices = @transform_1, window_bounds = array<i64: 256, 128>}, {pipeline_mode = #tpu.pipeline_mode<synchronous>, transform_indices = @transform_2, window_bounds = array<i64: 16, 128>}, {transform_indices = @transform_3, window_bounds = array<i64: 8, 16>}, {transform_indices = @transform_4, window_bounds = array<i64: 8, 128>}]} {
    %c0 = arith.constant 0 : index
    %c0_0 = arith.constant 0 : index
    %0 = vector.load %arg1[%c0, %c0_0] : memref<8x256xf32, #tpu.memory_space<vmem>>, vector<8x256xf32>
    %1 = arith.mulf %0, %0 : vector<8x256xf32>
    %c0_1 = arith.constant 0 : index
    %c0_2 = arith.constant 0 : index
    %2 = vector.load %arg2[%c0_1, %c0_2] : memref<256x128xf32, #tpu.memory_space<vmem>>, vector<256x128xf32>
    %cst = arith.constant dense<0.000000e+00> : vector<8x128xf32>
    %3 = tpu.matmul %1, %2, %cst {dimension_numbers = #tpu.dot_dimension_numbers<[1], [0], [0], [1], [0, 0, 1, 1], [], []>} : vector<8x256xf32>, vector<256x128xf32>, vector<8x128xf32> -> vector<8x128xf32>
    %c0_3 = arith.constant 0 : index
    %c0_4 = arith.constant 0 : index
    %4 = vector.load %arg4[%c0_3, %c0_4] : memref<8x16xi8, #tpu.memory_space<vmem>>, vector<8x16xi8>
    %5 = arith.sitofp %4 : vector<8x16xi8> to vector<8x16xf32>
    %cst_5 = arith.constant 1.000000e+00 : f32
    %6 = vector.broadcast %cst_5 : f32 to vector<8x16xf32>
    %7 = arith.subf %6, %5 : vector<8x16xf32>
    %c0_6 = arith.constant 0 : index
    %c0_7 = arith.constant 0 : index
    %8 = vector.load %arg3[%c0_6, %c0_7] : memref<16x128xf32, #tpu.memory_space<vmem>>, vector<16x128xf32>
    %cst_8 = arith.constant dense<0.000000e+00> : vector<8x128xf32>
    %9 = tpu.matmul %7, %8, %cst_8 {dimension_numbers = #tpu.dot_dimension_numbers<[1], [0], [0], [1], [0, 0, 1, 1], [], []>} : vector<8x16xf32>, vector<16x128xf32>, vector<8x128xf32> -> vector<8x128xf32>
    %10 = arith.mulf %3, %9 : vector<8x128xf32>
    %c0_9 = arith.constant 0 : index
    %c0_10 = arith.constant 0 : index
    %11 = vector.load %arg5[%c0_9, %c0_10] : memref<8x128xf32, #tpu.memory_space<vmem>>, vector<8x128xf32>
    tpu.vector_store %arg5[%c0_9, %c0_10], %10 {strides = array<i32>} : memref<8x128xf32, #tpu.memory_space<vmem>>, vector<8x128xf32>,
    return
  }
  func.func @transform_0(%arg0: i32) -> (i32, i32) {
    %c0_i32 = arith.constant 0 : i32
    %c0_i32_0 = arith.constant 0 : i32
    return %arg0, %c0_i32 : i32, i32
  }
  func.func @transform_1(%arg0: i32) -> (i32, i32) {
    %c0_i32 = arith.constant 0 : i32
    %c0_i32_0 = arith.constant 0 : i32
    %c0_i32_1 = arith.constant 0 : i32
    return %c0_i32, %c0_i32_0 : i32, i32
  }
  func.func @transform_2(%arg0: i32) -> (i32, i32) {
    %c0_i32 = arith.constant 0 : i32
    %c0_i32_0 = arith.constant 0 : i32
    %c0_i32_1 = arith.constant 0 : i32
    return %c0_i32, %c0_i32_0 : i32, i32
  }
  func.func @transform_3(%arg0: i32) -> (i32, i32) {
    %c0_i32 = arith.constant 0 : i32
    %c0_i32_0 = arith.constant 0 : i32
    return %arg0, %c0_i32 : i32, i32
  }
  func.func @transform_4(%arg0: i32) -> (i32, i32) {
    %c0_i32 = arith.constant 0 : i32
    %c0_i32_0 = arith.constant 0 : i32
    return %arg0, %c0_i32 : i32, i32
  }
}

</mosaic_0001>

<bundles_post_ra>
// kernel: tpu_custom_call.1
= control target key start
LH: loop header
LB: loop body
LE: loop exit
PB: predicated region body
PF: predicated region fallthrough
CT: control target
= control target key end

     0   :  { %9 = vsyncpa [#allocation3], 0  ;;  %s536_s0 = inlined_call_operand.hbm [shape: f32[8,256], index: 0, kind: input, shape index: {}]   ;;  %s537_s1 = inlined_call_operand.hbm [shape: f32[256,128], index: 1, kind: input, shape index: {}]   ;;  %s538_s2 = inlined_call_operand.hbm [shape: f32[16,128], index: 2, kind: input, shape index: {}]   ;;  %s539_s3 = inlined_call_operand.vmem [shape: s8[8,16], index: 3, kind: input, shape index: {}]   ;;  %s540_s4 = inlined_call_operand.hbm [shape: f32[8,128], index: 4, kind: output, shape index: {}]  }
   0x1   :  { %10 = vsyncpa [#allocation6], 0 }
   0x2   :  { %11 = vsyncpa [#allocation4], 0  ;;  %s445_s15 = smov [#allocation5]   ;;  %s351_s19 = scalar_lea.hbm %s537_s1, 4096 }
   0x3   :  { %s27_s16 = sshll.u32 %s445_s15, 4  ;;  %p352_p0 = scmp.ne.s32.totalorder %s537_s1, %s351_s19  ;;  %s28_s16 = int_to_ptr.vmem [resolvable:$true] %s27_s16 }
   0x4   :  { %p355_p1 = scmp.lt.u32.totalorder %s351_s19, %s537_s1 }
   0x6   :  { %p357_p2 = pnand %p355_p1, %p352_p0 }
   0x8   :  { %360 = shalt.err (!%p357_p2)
}
   0x9   :  { %s361_s24 = scalar_lea.vmem %s28_s16, 4096  ;;  %p366_p4 = scmp.lt.s32.totalorder %s28_s16, %s28_s16 }
   0xa   :  { %p362_p3 = scmp.ne.s32.totalorder %s28_s16, %s361_s24  ;;  %p367_p5 = scmp.lt.s32.totalorder %s361_s24, %s361_s24 }
   0xc   :  { %p368_p6 = por %p367_p5, %p366_p4 }
   0xe   :  { %p369_p7 = pnand %p368_p6, %p362_p3 }
  0x10   :  { %372 = shalt.err (!%p369_p7)
}
  0x11   :  { %s446_s25 = smov 128   ;;  %s447_s26 = smov 8  }
  0x12   :  { %33 = dma.hbm_to_vmem [thread:$0]  %s537_s1, 4096, %s28_s16, [#allocation6], %s446_s25, %s446_s25, %s447_s26  }
  0x13   :  { %s448_s29 = smov [#allocation2]   ;;  %s449_s5 = smov [#allocation7]  }
  0x14   :  { %s18_s30 = sshll.u32 %s448_s29, 4  ;;  %s39_s6 = sshll.u32 %s449_s5, 4  ;;  %s19_s30 = int_to_ptr.vmem [resolvable:$true] %s18_s30  ;;  %s40_s6 = int_to_ptr.vmem [resolvable:$true] %s39_s6 }
  0x15   :  { %s373_s9 = scalar_lea.hbm %s536_s0, 256 }
  0x16   :  { %p374_p8 = scmp.ne.s32.totalorder %s536_s0, %s373_s9  ;;  %p377_p9 = scmp.lt.u32.totalorder %s373_s9, %s536_s0 }
  0x18   :  { %p379_p10 = pnand %p377_p9, %p374_p8 }
  0x1a   :  { %382 = shalt.err (!%p379_p10)
}
  0x1b   :  { %s383_s1 = scalar_lea.vmem %s19_s30, 256  ;;  %p388_p12 = scmp.lt.s32.totalorder %s19_s30, %s19_s30 }
  0x1c   :  { %p384_p11 = scmp.ne.s32.totalorder %s19_s30, %s383_s1  ;;  %p389_p13 = scmp.lt.s32.totalorder %s383_s1, %s383_s1 }
  0x1e   :  { %p390_p0 = por %p389_p13, %p388_p12 }
  0x20   :  { %p391_p1 = pnand %p390_p0, %p384_p11 }
  0x22   :  { %394 = shalt.err (!%p391_p1)
}
  0x23   :  { %21 = dma.hbm_to_vmem [thread:$0]  %s536_s0, 256, %s19_s30, [#allocation3]  }
  0x24   :  { %s395_s18 = scalar_lea.hbm %s538_s2, 256 }
  0x25   :  { %p396_p2 = scmp.ne.s32.totalorder %s538_s2, %s395_s18  ;;  %p399_p3 = scmp.lt.u32.totalorder %s395_s18, %s538_s2 }
  0x27   :  { %p401_p4 = pnand %p399_p3, %p396_p2 }
  0x29   :  { %404 = shalt.err (!%p401_p4)
}
  0x2a   :  { %s405_s23 = scalar_lea.vmem %s40_s6, 256  ;;  %p410_p6 = scmp.lt.s32.totalorder %s40_s6, %s40_s6 }
  0x2b   :  { %p406_p5 = scmp.ne.s32.totalorder %s40_s6, %s405_s23  ;;  %p411_p7 = scmp.lt.s32.totalorder %s405_s23, %s405_s23 }
  0x2d   :  { %p412_p8 = por %p411_p7, %p410_p6 }
  0x2f   :  { %p413_p9 = pnand %p412_p8, %p406_p5 }
  0x31   :  { %416 = shalt.err (!%p413_p9)
}
  0x32   :  { %45 = dma.hbm_to_vmem [thread:$0]  %s538_s2, 256, %s40_s6, [#allocation6], %s446_s25, %s446_s25, %s447_s26  }
  0x33   :  { %439 = dma.done.wait [#allocation3], 256  }
  0x34   :  { %440 = vsyncadd [#allocation3], 4294967040 }
  0x35   :  { %441 = dma.done.wait [#allocation6], 4352  }
  0x36   :  { %442 = vsyncadd [#allocation6], 4294962944  ;;  %v450_v0 = vmov 0.0|0.0   ;;  %vm451_vm0 = vmmov 0   ;;  %v452_v1 = vmov 0.0   ;;  %v77_v2 = vld [vmem:[#allocation5 + $0x80] sm:$0xff] }
  0x37   :  { %339 = vmatprep.subr.bf16.mxu1 %v450_v0  ;;  %304 = vmatprep.mubr.msk.f32.mxu1 %vm451_vm0, %v452_v1  ;;  %v78_v3 = vld [vmem:[#allocation5 + $0x88] sm:$0xff]  ;;  %v61_v4 = vld [vmem:[#allocation5] sm:$0xff]  ;;  %v79_v7 = vld [vmem:[#allocation5 + $0x90] sm:$0xff]  ;;  %vm169_vm1 = vcmask 130048  }
  0x38   :  { %v307_v5 = vpack.c.bf16 %v78_v3, %v77_v2  ;;  %v62_v6 = vld [vmem:[#allocation5 + $0x8] sm:$0xff]  ;;  %v80_v8 = vld [vmem:[#allocation5 + $0x98] sm:$0xff]  ;;  %v63_v11 = vld [vmem:[#allocation5 + $0x10] sm:$0xff] }
  0x39   :  { %v309_v9 = vpack.c.bf16 %v62_v6, %v61_v4  ;;  %v311_v10 = vpack.c.bf16 %v80_v8, %v79_v7  ;;  %v64_v12 = vld [vmem:[#allocation5 + $0x18] sm:$0xff]  ;;  %v81_v13 = vld [vmem:[#allocation5 + $0xa0] sm:$0xff]  ;;  %v82_v14 = vld [vmem:[#allocation5 + $0xa8] sm:$0xff] }
  0x3a   :  { %308 = vmatprep.subr.bf16.mxu0 %v307_v5  ;;  %v313_v15 = vpack.c.bf16 %v64_v12, %v63_v11  ;;  %v315_v16 = vpack.c.bf16 %v82_v14, %v81_v13  ;;  %v65_v17 = vld [vmem:[#allocation5 + $0x20] sm:$0xff]  ;;  %v66_v18 = vld [vmem:[#allocation5 + $0x28] sm:$0xff]  ;;  %v83_v19 = vld [vmem:[#allocation5 + $0xb0] sm:$0xff] }
  0x3b   :  { %310 = vmatpush3.bf16.msra.mxu0 %v309_v9  ;;  %v84_v20 = vld [vmem:[#allocation5 + $0xb8] sm:$0xff]  ;;  %v317_v21 = vpack.c.bf16 %v66_v18, %v65_v17  ;;  %v67_v23 = vld [vmem:[#allocation5 + $0x30] sm:$0xff]  ;;  %v85_v25 = vld [vmem:[#allocation5 + $0xc0] sm:$0xff] }
  0x3c   :  { %312 = vmatprep.subr.bf16.mxu0 %v311_v10  ;;  %v319_v22 = vpack.c.bf16 %v84_v20, %v83_v19  ;;  %v68_v24 = vld [vmem:[#allocation5 + $0x38] sm:$0xff]  ;;  %v86_v26 = vld [vmem:[#allocation5 + $0xc8] sm:$0xff]  ;;  %v167_v29 = vld [vmem:[#allocation7] sm:$0xff] }
  0x3d   :  { %v58_v27 = vld [vmem:[#allocation2 + $0x8] sm:$0xff]  ;;  %v168_v30 = vld [vmem:[#allocation7 + $0x8] sm:$0xff]  ;;  %v321_v31 = vpack.c.bf16 %v68_v24, %v67_v23  ;;  %v163_v33 = vld [vmem:[%s539_s3] sm:$0x3]  ;;  %v323_v34 = vpack.c.bf16 %v86_v26, %v85_v25  ;;  %s453_s3 = smov [#allocation8]  }
  0x3e   :  { %v60_v28 = vmul.f32 %v58_v27, %v58_v27  ;;  %v340_v32 = vpack.c.bf16 %v168_v30, %v167_v29  ;;  %v69_v35 = vld [vmem:[#allocation5 + $0x40] sm:$0xff]  ;;  %v70_v36 = vld [vmem:[#allocation5 + $0x48] sm:$0xff]  ;;  %v164_v37 = vunpack.c.0.s8 %v163_v33  ;;  %v87_v38 = vld [vmem:[#allocation5 + $0xd0] sm:$0xff]  ;;  %s251_s26 = sshll.u32 %s453_s3, 4  ;;  %s252_s26 = int_to_ptr.vmem [resolvable:$true] %s251_s26 }
  0x3f   :  { %314 = vmatpush3.bf16.msra.mxu0 %v313_v15  ;;  %v88_v39 = vld [vmem:[#allocation5 + $0xd8] sm:$0xff]  ;;  %v325_v41 = vpack.c.bf16 %v70_v36, %v69_v35  ;;  %v71_v43 = vld [vmem:[#allocation5 + $0x50] sm:$0xff]  ;;  %v89_v46 = vld [vmem:[#allocation5 + $0xe0] sm:$0xff]  ;;  %s417_s27 = scalar_lea.vmem %s252_s26, 128  ;;  %p422_p11 = scmp.lt.s32.totalorder %s252_s26, %s252_s26 }
  0x40   :  { %316 = vmatprep.subr.bf16.mxu0 %v315_v16  ;;  %157 = vmatprep.mubr.f32.mxu0 %v60_v28  ;;  %v165_v40 = vcvt.s32.f32 %v164_v37  ;;  %v327_v42 = vpack.c.bf16 %v88_v39, %v87_v38  ;;  %v72_v44 = vld [vmem:[#allocation5 + $0x58] sm:$0xff]  ;;  %v90_v47 = vld [vmem:[#allocation5 + $0xe8] sm:$0xff]  ;;  %v73_v50 = vld [vmem:[#allocation5 + $0x60] sm:$0xff]  ;;  %p418_p10 = scmp.ne.s32.totalorder %s252_s26, %s417_s27  ;;  %p423_p12 = scmp.lt.s32.totalorder %s417_s27, %s417_s27 }
  0x41   :  { %341 = vmatpush3.bf16.msra.mxu1 %v340_v32  ;;  %v329_v48 = vpack.c.bf16 %v72_v44, %v71_v43  ;;  %v331_v49 = vpack.c.bf16 %v90_v47, %v89_v46  ;;  %v74_v51 = vld [vmem:[#allocation5 + $0x68] sm:$0xff]  ;;  %v91_v52 = vld [vmem:[#allocation5 + $0xf0] sm:$0xff]  ;;  %v92_v53 = vld [vmem:[#allocation5 + $0xf8] sm:$0xff] }
  0x42   :  { %v166_v45 = vsub.f32 1.0, %v165_v40  ;;  %v333_v54 = vpack.c.bf16 %v74_v51, %v73_v50  ;;  %v335_v55 = vpack.c.bf16 %v92_v53, %v91_v52  ;;  %v75_v56 = vld [vmem:[#allocation5 + $0x70] sm:$0xff]  ;;  %v76_v57 = vld [vmem:[#allocation5 + $0x78] sm:$0xff]  ;;  %p424_p13 = por %p423_p12, %p422_p11 }
  0x43   :  { %318 = vmatpush3.bf16.msra.mxu0 %v317_v21  ;;  %v337_v58 = vpack.c.bf16 %v76_v57, %v75_v56  ;;  %v57_v59 = vld [vmem:[#allocation2] sm:$0xff] }
  0x44   :  { %320 = vmatprep.subr.bf16.mxu0 %v319_v22  ;;  %305 = vmatmul.mubr.msk.f32.vlgmr.msra.gmra.mrb[0].mxu1 %vm169_vm1, %v166_v45  ;;  %v59_v60 = vmul.f32 %v57_v59, %v57_v59  ;;  %p425_p0 = pnand %p424_p13, %p418_p10 }
  0x47   :  { %322 = vmatpush3.bf16.msra.mxu0 %v321_v31 }
  0x48   :  { %324 = vmatprep.subr.bf16.mxu0 %v323_v34 }
  0x4b   :  { %326 = vmatpush3.bf16.msra.mxu0 %v325_v41 }
  0x4c   :  { %328 = vmatprep.subr.bf16.mxu0 %v327_v42 }
  0x4f   :  { %330 = vmatpush3.bf16.msra.mxu0 %v329_v48 }
  0x50   :  { %332 = vmatprep.subr.bf16.mxu0 %v331_v49 }
  0x53   :  { %334 = vmatpush3.bf16.msra.mxu0 %v333_v54 }
  0x54   :  { %336 = vmatprep.subr.bf16.mxu0 %v335_v55 }
  0x57   :  { %338 = vmatpush3.bf16.msra.mxu0 %v337_v58 }
  0x5a   :  { %158 = vmatmul.mubr.f32.vlgmr.msra.gmra.mrb[0].mxu0 %v59_v60 }
 0x117   :  { %v239_v61 = vpop.f32.mrb[0].mxu1 }
 0x118   :  { %v306_v62 = vpop.f32.mrb[1].mxu1 }
 0x12d   :  { %v294_v63 = vpop.f32.mrb[0].mxu0 }
 0x12e   :  { %v295_v0 = vpop.f32.mrb[1].mxu0 }
 0x12f   :  { %v296_v1 = vadd.f32 %v295_v0, %v294_v63 }
 0x131   :  { %v243_v2 = vmul.f32 %v296_v1, %v239_v61 }
 0x133   :  { %244 = vst [vmem:[#allocation8] sm:$0xff] %v243_v2 }
 0x134   :  { %428 = shalt.err (!%p425_p0)
}
 0x135   :  { %s429_s30 = scalar_lea.hbm %s540_s4, 128 }
 0x136   :  { %p430_p1 = scmp.ne.s32.totalorder %s540_s4, %s429_s30  ;;  %p433_p2 = scmp.lt.u32.totalorder %s429_s30, %s540_s4 }
 0x138   :  { %p435_p3 = pnand %p433_p2, %p430_p1 }
 0x13a   :  { %438 = shalt.err (!%p435_p3)
}
 0x13b   :  { %254 = dma.vmem_to_hbm [thread:$0]  %s252_s26, 128, %s540_s4, [#allocation4]  }
 0x13c   :  { %443 = dma.done.wait [#allocation4], 128  }
 0x13d   :  { %444 = vsyncadd [#allocation4], 4294967168 }
 0x13e   :  { %258 = vsyncpa [#allocation3], 1 }
 0x13f   :  { %259 = vsyncpa [#allocation6], 1 }
 0x140   :  { %260 = vsyncpa [#allocation4], 1 }

</bundles_post_ra>
